<compile_context>
chip_gen: v7x
topology: tpu7x:2x2x1
jax: 0.10.0
libtpu: 0.0.40
codegen_flags: <defaults>
</compile_context>

<pallas_src>
import functools

import numpy as np
import jax
import jax.numpy as jnp
from jax.experimental import pallas as pl
from jax.experimental.pallas import tpu as pltpu

_F32 = jnp.float32
_BF16 = jnp.bfloat16


# ----------------------------- small helpers --------------------------------
def _rup(n, m):
    n = max(int(n), 1)
    return ((n + m - 1) // m) * m


def _row_tile(nl):
    return max(t for t in (512, 256, 128) if nl % t == 0)


def _pad2d(x, rows, cols, dtype=None):
    x = jnp.asarray(x)
    r, c = x.shape
    x = jnp.pad(x, ((0, rows - r), (0, cols - c)))
    return x if dtype is None else x.astype(dtype)


@functools.lru_cache(maxsize=None)
def _vmem_limit_bytes():
    # Key the scoped-VMEM limit off the chip; keep ~25% headroom for Mosaic's
    # own scratch (review: 96 MiB on v5e/v6e, ~48 MiB on v7x).
    try:
        cap = int(pltpu.get_tpu_info().vmem_capacity_bytes)
    except Exception:
        cap = 128 << 20
    return int(cap * 3 // 4)


def _cparams(sem):
    return pltpu.CompilerParams(dimension_semantics=sem,
                                vmem_limit_bytes=_vmem_limit_bytes())


@functools.lru_cache(maxsize=None)
def _single_buffer_ok():
    """Probe once whether pipeline_mode=pl.Buffered(1) is supported (and correct)."""
    if not hasattr(pl, "Buffered"):
        return False

    def k(x_ref, o_ref):
        o_ref[...] = x_ref[...] + 1.0

    try:
        spec = pl.BlockSpec((8, 128), lambda i: (0, 0), pipeline_mode=pl.Buffered(1))
        out = pl.pallas_call(
            k, grid=(1,),
            in_specs=[spec],
            out_specs=pl.BlockSpec((8, 128), lambda i: (0, 0)),
            out_shape=jax.ShapeDtypeStruct((8, 128), _F32),
        )(jnp.zeros((8, 128), _F32))
        return bool(np.allclose(np.asarray(out), 1.0))
    except Exception:
        return False


def _const_spec(shape):
    """Full-array operand whose block never changes across the grid.
    Single-buffered when supported (no point double-buffering a constant block)."""
    nd = len(shape)
    if _single_buffer_ok():
        return pl.BlockSpec(tuple(shape), lambda *_: (0,) * nd,
                            pipeline_mode=pl.Buffered(1))
    return pl.BlockSpec(tuple(shape), lambda *_: (0,) * nd)


# --------------------------- GINConv (+ fused MLP) ---------------------------
@functools.lru_cache(maxsize=None)
def _gin_call(nl, fl, hl, ol, tm):
    """relu(fc3(relu(fc2(relu(fc1((A.T + I) @ x))))))  -- BN folded, bf16 weights."""

    def kernel(a_ref, x_ref, w1, b1, w2, b2, w3, b3, o_ref):
        h = jnp.dot(a_ref[...], x_ref[...], preferred_element_type=_F32)   # bf16 MXU
        z = jnp.maximum(jnp.dot(h.astype(_BF16), w1[...], preferred_element_type=_F32) + b1[...], 0.0)
        z = jnp.maximum(jnp.dot(z.astype(_BF16), w2[...], preferred_element_type=_F32) + b2[...], 0.0)
        z = jnp.maximum(jnp.dot(z.astype(_BF16), w3[...], preferred_element_type=_F32) + b3[...], 0.0)
        o_ref[...] = z

    return pl.pallas_call(
        kernel,
        grid=(nl // tm,),
        in_specs=[pl.BlockSpec((tm, nl), lambda i: (i, 0)),   # (A.T + I) row tile
                  _const_spec((nl, fl)),                      # x (bf16, zero padded)
                  _const_spec((fl, hl)), _const_spec((1, hl)),
                  _const_spec((hl, hl)), _const_spec((1, hl)),
                  _const_spec((hl, ol)), _const_spec((1, ol))],
        out_specs=pl.BlockSpec((tm, ol), lambda i: (i, 0)),
        out_shape=jax.ShapeDtypeStruct((nl, ol), _F32),
        compiler_params=_cparams(("parallel",)),
    )


def gin_conv(mlp6, aaggI_bf, x_dev, n, out_dim):
    nl = aaggI_bf.shape[0]
    w1, b1, w2, b2, w3, b3 = mlp6
    fl, hl, ol = w1.shape[0], w1.shape[1], w3.shape[1]
    xp = _pad2d(jnp.asarray(x_dev, _F32), nl, fl, _BF16)
    out = _gin_call(nl, fl, hl, ol, _row_tile(nl))(aaggI_bf, xp, w1, b1, w2, b2, w3, b3)
    return out[:n, :out_dim]


# ------------------------------ entropy kernel -------------------------------
@functools.lru_cache(maxsize=None)
def _entropy_call(nl, fl, tm):
    """||deg*x^2 - 2*x*(A@x) + A@(x^2)||_2 per node (Laplacian folded, sqrt fused).
    The cancellation-prone V math stays in f32; degrees are computed in-kernel."""

    def kernel(a_ref, xf_ref, xt_ref, o_ref):
        a = a_ref[...].astype(_F32)                            # (tm, nl) 0/1
        deg = jnp.sum(a, axis=1, keepdims=True)                # row degrees (XLU)
        xf = xf_ref[...]                                       # (nl, fl) f32
        xt = xt_ref[...]                                       # (tm, fl) f32
        ax = jnp.dot(a, xf, preferred_element_type=_F32)
        axx = jnp.dot(a, xf * xf, preferred_element_type=_F32)
        v = deg * xt * xt - 2.0 * xt * ax + axx
        vn = jnp.sqrt(jnp.sum(v * v, axis=1, keepdims=True))
        o_ref[...] = jnp.broadcast_to(vn, (tm, 128))           # lane-dense store

    return pl.pallas_call(
        kernel,
        grid=(nl // tm,),
        in_specs=[pl.BlockSpec((tm, nl), lambda i: (i, 0)),    # A row tile
                  _const_spec((nl, fl)),                       # x full (RHS)
                  pl.BlockSpec((tm, fl), lambda i: (i, 0))],   # x row tile (elementwise)
        out_specs=pl.BlockSpec((tm, 128), lambda i: (i, 0)),
        out_shape=jax.ShapeDtypeStruct((nl, 128), _F32),
        compiler_params=_cparams(("parallel",)),
    )


def entropy_vnorm(a_bf, x_dev, n):
    nl = a_bf.shape[0]
    fl = _rup(x_dev.shape[1], 128)
    xp = _pad2d(jnp.asarray(x_dev, _F32), nl, fl)
    out = _entropy_call(nl, fl, _row_tile(nl))(a_bf, xp, xp)
    return out[:n, 0]


# ------------------------- fused MEWISPool GIN stack --------------------------
@functools.lru_cache(maxsize=None)
def _pool_gin3_call(nl, wshapes):
    """Fused gc1 -> gc2 -> gc3 (GINConv + MLP each) + sigmoid.  (A.T + I) stays
    resident in VMEM across all three layers; square zero-padded A means padded
    rows never leak into real rows, so no repack scratch is needed."""
    # TODO(synk): for NL beyond a few thousand nodes this grid=(1,) fused stack
    # should be split per-layer with row tiling to respect v7x's 64 MiB VMEM.

    def kernel(a_ref, e_ref,
               w11, b11, w12, b12, w13, b13,
               w21, b21, w22, b22, w23, b23,
               w31, b31, w32, b32, w33, b33, o_ref):
        def mlp(h, w1, b1, w2, b2, w3, b3):
            z = jnp.maximum(jnp.dot(h.astype(_BF16), w1[...], preferred_element_type=_F32) + b1[...], 0.0)
            z = jnp.maximum(jnp.dot(z.astype(_BF16), w2[...], preferred_element_type=_F32) + b2[...], 0.0)
            z = jnp.maximum(jnp.dot(z.astype(_BF16), w3[...], preferred_element_type=_F32) + b3[...], 0.0)
            return z

        a = a_ref[...]                                               # (nl, nl) bf16
        z = mlp(jnp.dot(a, e_ref[...], preferred_element_type=_F32),
                w11, b11, w12, b12, w13, b13)
        z = mlp(jnp.dot(a, z.astype(_BF16), preferred_element_type=_F32),
                w21, b21, w22, b22, w23, b23)
        z = mlp(jnp.dot(a, z.astype(_BF16), preferred_element_type=_F32),
                w31, b31, w32, b32, w33, b33)
        o_ref[...] = pl.reciprocal(1.0 + jnp.exp(-z), approx=True)   # sigmoid on EUP

    in_specs = [_const_spec((nl, nl)), _const_spec((nl, 128))]
    in_specs += [_const_spec(s) for s in wshapes]
    return pl.pallas_call(
        kernel,
        grid=(1,),
        in_specs=in_specs,
        out_specs=pl.BlockSpec((nl, 128), lambda i: (0, 0)),
        out_shape=jax.ShapeDtypeStruct((nl, 128), _F32),
        compiler_params=_cparams(("arbitrary",)),
    )


def pool_gin3(pool_mlps, aaggI_bf, entropies_dev, n):
    nl = aaggI_bf.shape[0]
    weights = list(pool_mlps["gc1"]) + list(pool_mlps["gc2"]) + list(pool_mlps["gc3"])
    wshapes = tuple(tuple(int(d) for d in w.shape) for w in weights)
    ep = _pad2d(jnp.asarray(entropies_dev, _F32), nl, 128, _BF16)
    out = _pool_gin3_call(nl, wshapes)(aaggI_bf, ep, *weights)
    return out[:n, 0:1]


# --------------------------- clamp(A^2 + A^3, 0, 1) ---------------------------
@functools.lru_cache(maxsize=None)
def _a2a3_call(nl, tm):
    """Row-tiled clamp(A@A + A@A@A, 0, 1); the square padded A is both the LHS
    row tile and the (resident) RHS -- no scratch, bf16 output."""

    def kernel(arow_ref, afull_ref, o_ref):
        a2 = jnp.dot(arow_ref[...], afull_ref[...], preferred_element_type=_F32)
        a3 = jnp.dot(a2.astype(_BF16), afull_ref[...], preferred_element_type=_F32)
        o_ref[...] = jnp.clip(a2 + a3, 0.0, 1.0).astype(_BF16)

    return pl.pallas_call(
        kernel,
        grid=(nl // tm,),
        in_specs=[pl.BlockSpec((tm, nl), lambda i: (i, 0)),
                  _const_spec((nl, nl))],
        out_specs=pl.BlockSpec((tm, nl), lambda i: (i, 0)),
        out_shape=jax.ShapeDtypeStruct((nl, nl), _BF16),
        compiler_params=_cparams(("parallel",)),
    )


def a2a3_clamped(a_bf):
    nl = a_bf.shape[0]
    return _a2a3_call(nl, _row_tile(nl))(a_bf, a_bf)


# ------------------------------ classification head ---------------------------
@functools.lru_cache(maxsize=None)
def _head_call(gp, nl2, hl, cl):
    def kernel(m_ref, x_ref, w1, b1, w2, b2, o_ref):
        r = jnp.dot(m_ref[...], x_ref[...], preferred_element_type=_F32)   # mean readout
        z = jnp.maximum(jnp.dot(r.astype(_BF16), w1[...], preferred_element_type=_F32) + b1[...], 0.0)
        o = jnp.dot(z.astype(_BF16), w2[...], preferred_element_type=_F32) + b2[...]
        mx = jnp.max(o, axis=-1, keepdims=True)
        lse = mx + jnp.log(jnp.sum(jnp.exp(o - mx), axis=-1, keepdims=True))
        o_ref[...] = o - lse

    shapes = ((gp, nl2), (nl2, hl), (hl, hl), (1, hl), (hl, cl), (1, cl))
    return pl.pallas_call(
        kernel,
        grid=(1,),
        in_specs=[_const_spec(s) for s in shapes],
        out_specs=pl.BlockSpec((gp, cl), lambda i: (0, 0)),
        out_shape=jax.ShapeDtypeStruct((gp, cl), _F32),
        compiler_params=_cparams(("arbitrary",)),
    )


def head_forward(head4, M_np, x_dev, num_classes):
    fw1, fb1, fw2, fb2 = head4
    g, n2 = M_np.shape
    gp, nl2 = _rup(g, 8), _rup(n2, 128)
    hl, cl = fw1.shape[0], fw2.shape[1]
    Mp = _pad2d(jnp.asarray(M_np, _F32), gp, nl2)
    xp = _pad2d(jnp.asarray(x_dev, _F32), nl2, hl)
    out = _head_call(gp, nl2, hl, cl)(Mp, xp, fw1, fb1, fw2, fb2)
    return out[:g, :num_classes]


# ------------------------------ host-side glue -------------------------------
def dense_adjacency(edge_index, n):
    A = np.zeros((n, n), dtype=np.float32)
    if edge_index.shape[1] > 0:
        A[edge_index[0], edge_index[1]] = 1.0
    return A


def build_adjacency(edge_index, n):
    """Host dense A plus square zero-padded bf16 device copies of A and (A.T + I)."""
    A = dense_adjacency(edge_index, n)
    nl = _rup(n, 128)
    A_bf = _pad2d(jnp.asarray(A, _F32), nl, nl, _BF16)
    AaggI_bf = _pad2d(jnp.asarray(A.T + np.eye(n, dtype=np.float32), _F32), nl, nl, _BF16)
    return A, A_bf, AaggI_bf


@functools.partial(jax.jit, static_argnums=(2,))
def _segment_entropy(v, seg, num_segments):
    # per-graph softmax over vnorm, then H = -P*log(P) with P[P==0] -> 1
    m = jax.ops.segment_max(v, seg, num_segments=num_segments)
    e = jnp.exp(v - m[seg])
    s = jax.ops.segment_sum(e, seg, num_segments=num_segments)
    P = e / s[seg]
    P = jnp.where(P == 0.0, 1.0, P)
    return (-P * jnp.log(P))[:, None]


def loss_fn(entropies, probabilities, A, gamma):
    term1 = -float(np.dot(entropies, probabilities))
    term2 = float(probabilities @ A @ probabilities)
    return float(gamma) + term1 + term2


def conditional_expectation(entropies, probabilities, A, threshold, gamma):
    # TODO(synk): the data-dependent greedy independent-set construction has no
    # clean Pallas equivalent; kept as a host loop mirroring the PyTorch reference.
    probs = np.asarray(probabilities).reshape(-1)
    order = np.argsort(-probs)
    dummy = probs.copy()
    selected, rejected = set(), set()
    for node_index in order:
        node_index = int(node_index)
        neighbors = np.where(A[node_index] == 1)[0]
        if len(neighbors) == 0:
            selected.add(node_index)
            continue
        if node_index not in rejected and node_index not in selected:
            s = dummy.copy()
            s[node_index] = 1.0
            s[neighbors] = 0.0
            loss = loss_fn(entropies, s, A, gamma)
            if loss <= threshold:
                selected.add(node_index)
                for nb in neighbors.tolist():
                    rejected.add(int(nb))
                dummy[node_index] = 1.0
                dummy[neighbors] = 0.0
    return sorted(selected)


def mewis_pool(pool_mlps, x_dev, A_np, A_bf, AaggI_bf, has_edges, batch):
    x_dev = jnp.asarray(x_dev, _F32)
    n = int(x_dev.shape[0])
    if has_edges:
        v = entropy_vnorm(A_bf, x_dev, n)
        uniq, seg_ids = np.unique(batch, return_inverse=True)
        entropies = _segment_entropy(v, jnp.asarray(seg_ids, jnp.int32), int(len(uniq)))
    else:
        entropies = jnp.ones((n, 1), _F32)                           # norm / norm

    probabilities = pool_gin3(pool_mlps, AaggI_bf, entropies, n)     # (n, 1) device
    S_dev = a2a3_clamped(A_bf)      # dispatched before host sync -> overlaps greedy loop

    ent_np = np.asarray(entropies).reshape(-1).astype(np.float32)
    prob_np = np.asarray(probabilities).reshape(-1).astype(np.float32)
    gamma = float(ent_np.sum())
    loss = loss_fn(ent_np, prob_np, A_np, gamma)
    mewis = conditional_expectation(ent_np, prob_np, A_np, loss, gamma)

    # graph reconstruction: adj_pooled = (1 - I) * clamp(A^2 + A^3, 0, 1)[mewis][:, mewis]
    idx = np.asarray(mewis, dtype=np.int64)
    k = len(mewis)
    S_np = np.asarray(S_dev[:n, :n]).astype(np.float32)
    adj_pooled = (np.ones((k, k), np.float32) - np.eye(k, dtype=np.float32)) * S_np[np.ix_(idx, idx)]
    x_pooled = x_dev[jnp.asarray(idx)]                               # device gather
    r1, r2 = np.where(adj_pooled > 0)
    edge_index_pooled = np.stack([r1, r2], axis=0).astype(np.int64)
    batch_pooled = np.asarray(batch)[idx]
    return x_pooled, edge_index_pooled, batch_pooled, loss, mewis


# ------------------------------ parameter init -------------------------------
def init_linear(key, fin, fout):
    kw, kb = jax.random.split(key)
    bound = 1.0 / np.sqrt(fin)
    w = jax.random.uniform(kw, (fin, fout), dtype=_F32, minval=-bound, maxval=bound)
    b = jax.random.uniform(kb, (fout,), dtype=_F32, minval=-bound, maxval=bound)
    return np.asarray(w), np.asarray(b)


def init_mlp(key, fin, hid, fout, enhance):
    k1, k2, k3 = jax.random.split(key, 3)
    w1, b1 = init_linear(k1, fin, hid)
    w2, b2 = init_linear(k2, hid, hid)
    w3, b3 = init_linear(k3, hid, fout)
    if enhance:  # eval-mode BatchNorm1d: running mean 0, var 1, gamma 1, beta 0
        s = np.full((hid,), 1.0 / np.sqrt(1.0 + 1e-5), np.float32)
    else:
        s = np.ones((hid,), np.float32)
    t = np.zeros((hid,), np.float32)
    return dict(w1=w1, b1=b1, s1=s.copy(), t1=t.copy(),
                w2=w2, b2=b2, s2=s.copy(), t2=t.copy(),
                w3=w3, b3=b3)


def init_net(key, input_dim, hidden_dim, num_classes):
    ks = jax.random.split(key, 11)
    params = dict(
        gc1=init_mlp(ks[0], input_dim, hidden_dim, hidden_dim, True),
        pool1=dict(gc1=init_mlp(ks[1], 1, hidden_dim, hidden_dim, False),
                   gc2=init_mlp(ks[2], hidden_dim, hidden_dim, hidden_dim, False),
                   gc3=init_mlp(ks[3], hidden_dim, hidden_dim, 1, False)),
        gc2=init_mlp(ks[4], hidden_dim, hidden_dim, hidden_dim, True),
        pool2=dict(gc1=init_mlp(ks[5], 1, hidden_dim, hidden_dim, False),
                   gc2=init_mlp(ks[6], hidden_dim, hidden_dim, hidden_dim, False),
                   gc3=init_mlp(ks[7], hidden_dim, hidden_dim, 1, False)),
        gc3=init_mlp(ks[8], hidden_dim, hidden_dim, hidden_dim, True),
    )
    fw1, fb1 = init_linear(ks[9], hidden_dim, hidden_dim)
    fw2, fb2 = init_linear(ks[10], hidden_dim, num_classes)
    params["head"] = dict(fw1=fw1, fb1=fb1, fw2=fw2, fb2=fb2)
    return params


def _fold_bn(mp):
    # fold eval-mode BatchNorm into fc1/fc2 (exact identity in eval; Dropout = identity)
    w1 = mp["w1"] * mp["s1"][None, :]
    b1 = mp["b1"] * mp["s1"] + mp["t1"]
    w2 = mp["w2"] * mp["s2"][None, :]
    b2 = mp["b2"] * mp["s2"] + mp["t2"]
    return w1, b1, w2, b2, mp["w3"], mp["b3"]


def _pad_mlp(mlp6):
    # weights -> bf16 (native MXU path), biases stay f32
    w1, b1, w2, b2, w3, b3 = mlp6
    fl, hl = _rup(w1.shape[0], 128), _rup(w1.shape[1], 128)
    ol = _rup(w3.shape[1], 128)
    return (_pad2d(jnp.asarray(w1, _F32), fl, hl, _BF16),
            _pad2d(jnp.asarray(b1, _F32)[None, :], 1, hl),
            _pad2d(jnp.asarray(w2, _F32), hl, hl, _BF16),
            _pad2d(jnp.asarray(b2, _F32)[None, :], 1, hl),
            _pad2d(jnp.asarray(w3, _F32), hl, ol, _BF16),
            _pad2d(jnp.asarray(b3, _F32)[None, :], 1, ol))


def prepare_device_params(params, hidden_dim, num_classes):
    dp = dict(hidden_dim=hidden_dim, num_classes=num_classes)
    for name in ("gc1", "gc2", "gc3"):
        dp[name] = _pad_mlp(_fold_bn(params[name]))
    for name in ("pool1", "pool2"):
        dp[name] = {k: _pad_mlp(_fold_bn(params[name][k])) for k in ("gc1", "gc2", "gc3")}
    hl, cl = _rup(hidden_dim, 128), _rup(num_classes, 128)
    h = params["head"]
    fb2 = np.full((1, cl), -1e30, np.float32)  # mask padded classes out of log_softmax
    fb2[0, :num_classes] = h["fb2"]
    dp["head"] = (_pad2d(jnp.asarray(h["fw1"], _F32), hl, hl, _BF16),
                  _pad2d(jnp.asarray(h["fb1"], _F32)[None, :], 1, hl),
                  _pad2d(jnp.asarray(h["fw2"], _F32), hl, cl, _BF16),
                  jnp.asarray(fb2))
    return dp


# --------------------------------- Net.forward -------------------------------
def net_forward(dev_params, x, edge_index, batch, num_classes):
    hidden = dev_params["hidden_dim"]
    x_dev = jnp.asarray(x, _F32)
    n0 = int(x_dev.shape[0])

    # stage 0: adjacency shared by gc1 / pool1 (uploaded once per stage)
    A0, A0_bf, A0aggI_bf = build_adjacency(edge_index, n0)
    h = gin_conv(dev_params["gc1"], A0aggI_bf, x_dev, n0, hidden)    # Net's extra relu is idempotent
    xp1, ei1, b1, loss1, _ = mewis_pool(dev_params["pool1"], h, A0, A0_bf, A0aggI_bf,
                                        edge_index.shape[1] != 0, batch)

    n1 = int(xp1.shape[0])
    A1, A1_bf, A1aggI_bf = build_adjacency(ei1, n1)
    xp1 = gin_conv(dev_params["gc2"], A1aggI_bf, xp1, n1, hidden)
    xp2, ei2, b2, loss2, _ = mewis_pool(dev_params["pool2"], xp1, A1, A1_bf, A1aggI_bf,
                                        ei1.shape[1] != 0, b1)

    n2 = int(xp2.shape[0])
    _, _, A2aggI_bf = build_adjacency(ei2, n2)
    xp2 = gin_conv(dev_params["gc3"], A2aggI_bf, xp2, n2, hidden)

    # per-graph mean readout as an averaging matrix, fused into the head kernel
    uniq = np.unique(b2)
    M = np.zeros((len(uniq), n2), np.float32)
    for gi, g in enumerate(uniq):
        mask = (b2 == g)
        M[gi, mask] = 1.0 / float(mask.sum())
    logp = head_forward(dev_params["head"], M, xp2, num_classes)     # log_softmax in kernel
    return logp, float(loss1 + loss2)


# ------------------------------------ main ------------------------------------
if __name__ == "__main__":
    input_dim, hidden_dim, num_classes = 16, 32, 3
    ring, num_graphs = 6, 2
    nodes_per_graph = ring + 1            # 6-node ring + 1 isolated node per graph
    n_nodes = nodes_per_graph * num_graphs

    edges = []
    for g in range(num_graphs):
        off = g * nodes_per_graph
        for i in range(ring):
            a, b = off + i, off + (i + 1) % ring
            edges.append((a, b))
            edges.append((b, a))
    edge_index = np.array(edges, dtype=np.int64).T                   # (2, E)
    batch = np.repeat(np.arange(num_graphs), nodes_per_graph)

    key = jax.random.PRNGKey(0)
    kx, kp = jax.random.split(key)
    x = jax.random.normal(kx, (n_nodes, input_dim), dtype=_F32)
    params = init_net(kp, input_dim, hidden_dim, num_classes)
    dev_params = prepare_device_params(params, hidden_dim, num_classes)

    logp, total_loss = net_forward(dev_params, x, edge_index, batch, num_classes)
    logp = jax.block_until_ready(logp)
    assert logp.shape[1] == num_classes
    assert np.all(np.isfinite(np.asarray(logp)))
    assert np.isfinite(total_loss)
    print("KERNEL_OK")
</pallas_src>

<mosaic_0001>
module attributes {stable_mosaic.version = 11 : i64} {
  func.func @k(%arg0: i32, %arg1: memref<8x128xf32, #tpu.memory_space<vmem>>, %arg2: memref<8x128xf32, #tpu.memory_space<vmem>>) attributes {dimension_semantics = [#tpu.dimension_semantics<arbitrary>], iteration_bounds = array<i64: 1>, scalar_prefetch = 0 : i64, scratch_operands = 0 : i64, tpu.core_type = #tpu.core_type<tc>, window_params = [{pipeline_mode = #tpu.pipeline_mode<synchronous>, transform_indices = @transform_0, window_bounds = array<i64: 8, 128>}, {pipeline_mode = #tpu.pipeline_mode<synchronous>, transform_indices = @transform_1, window_bounds = array<i64: 8, 128>}]} {
    %c0 = arith.constant 0 : index
    %c0_0 = arith.constant 0 : index
    %0 = vector.load %arg1[%c0, %c0_0] : memref<8x128xf32, #tpu.memory_space<vmem>>, vector<8x128xf32>
    %cst = arith.constant 1.000000e+00 : f32
    %1 = vector.broadcast %cst : f32 to vector<8x128xf32>
    %2 = arith.addf %0, %1 : vector<8x128xf32>
    %c0_1 = arith.constant 0 : index
    %c0_2 = arith.constant 0 : index
    %3 = vector.load %arg2[%c0_1, %c0_2] : memref<8x128xf32, #tpu.memory_space<vmem>>, vector<8x128xf32>
    tpu.vector_store %arg2[%c0_1, %c0_2], %2 {strides = array<i32>} : memref<8x128xf32, #tpu.memory_space<vmem>>, vector<8x128xf32>,
    return
  }
  func.func @transform_0(%arg0: i32) -> (i32, i32) {
    %c0_i32 = arith.constant 0 : i32
    %c0_i32_0 = arith.constant 0 : i32
    %c0_i32_1 = arith.constant 0 : i32
    return %c0_i32, %c0_i32_0 : i32, i32
  }
  func.func @transform_1(%arg0: i32) -> (i32, i32) {
    %c0_i32 = arith.constant 0 : i32
    %c0_i32_0 = arith.constant 0 : i32
    %c0_i32_1 = arith.constant 0 : i32
    return %c0_i32, %c0_i32_0 : i32, i32
  }
}

module attributes {stable_mosaic.version = 11 : i64} {
  func.func @kernel(%arg0: i32, %arg1: memref<128x128xbf16, #tpu.memory_space<vmem>>, %arg2: memref<128x128xbf16, #tpu.memory_space<vmem>>, %arg3: memref<128x128xbf16, #tpu.memory_space<vmem>>, %arg4: memref<1x128xf32, #tpu.memory_space<vmem>>, %arg5: memref<128x128xbf16, #tpu.memory_space<vmem>>, %arg6: memref<1x128xf32, #tpu.memory_space<vmem>>, %arg7: memref<128x128xbf16, #tpu.memory_space<vmem>>, %arg8: memref<1x128xf32, #tpu.memory_space<vmem>>, %arg9: memref<128x128xf32, #tpu.memory_space<vmem>>) attributes {dimension_semantics = [#tpu.dimension_semantics<parallel>], iteration_bounds = array<i64: 1>, scalar_prefetch = 0 : i64, scratch_operands = 0 : i64, tpu.core_type = #tpu.core_type<tc>, window_params = [{transform_indices = @transform_0, window_bounds = array<i64: 128, 128>}, {pipeline_mode = #tpu.pipeline_mode<synchronous>, transform_indices = @transform_1, window_bounds = array<i64: 128, 128>}, {pipeline_mode = #tpu.pipeline_mode<synchronous>, transform_indices = @transform_2, window_bounds = array<i64: 128, 128>}, {pipeline_mode = #tpu.pipeline_mode<synchronous>, transform_indices = @transform_3, window_bounds = array<i64: 1, 128>}, {pipeline_mode = #tpu.pipeline_mode<synchronous>, transform_indices = @transform_4, window_bounds = array<i64: 128, 128>}, {pipeline_mode = #tpu.pipeline_mode<synchronous>, transform_indices = @transform_5, window_bounds = array<i64: 1, 128>}, {pipeline_mode = #tpu.pipeline_mode<synchronous>, transform_indices = @transform_6, window_bounds = array<i64: 128, 128>}, {pipeline_mode = #tpu.pipeline_mode<synchronous>, transform_indices = @transform_7, window_bounds = array<i64: 1, 128>}, {transform_indices = @transform_8, window_bounds = array<i64: 128, 128>}]} {
    %c0 = arith.constant 0 : index
    %c0_0 = arith.constant 0 : index
    %0 = vector.load %arg1[%c0, %c0_0] : memref<128x128xbf16, #tpu.memory_space<vmem>>, vector<128x128xbf16>
    %c0_1 = arith.constant 0 : index
    %c0_2 = arith.constant 0 : index
    %1 = vector.load %arg2[%c0_1, %c0_2] : memref<128x128xbf16, #tpu.memory_space<vmem>>, vector<128x128xbf16>
    %cst = arith.constant dense<0.000000e+00> : vector<128x128xf32>
    %2 = tpu.matmul %0, %1, %cst {dimension_numbers = #tpu.dot_dimension_numbers<[1], [0], [0], [1], [0, 0, 1, 1], [], []>} : vector<128x128xbf16>, vector<128x128xbf16>, vector<128x128xf32> -> vector<128x128xf32>
    %3 = arith.truncf %2 : vector<128x128xf32> to vector<128x128xbf16>
    %c0_3 = arith.constant 0 : index
    %c0_4 = arith.constant 0 : index
    %4 = vector.load %arg3[%c0_3, %c0_4] : memref<128x128xbf16, #tpu.memory_space<vmem>>, vector<128x128xbf16>
    %cst_5 = arith.constant dense<0.000000e+00> : vector<128x128xf32>
    %5 = tpu.matmul %3, %4, %cst_5 {dimension_numbers = #tpu.dot_dimension_numbers<[1], [0], [0], [1], [0, 0, 1, 1], [], []>} : vector<128x128xbf16>, vector<128x128xbf16>, vector<128x128xf32> -> vector<128x128xf32>
    %c0_6 = arith.constant 0 : index
    %c0_7 = arith.constant 0 : index
    %6 = vector.load %arg4[%c0_6, %c0_7] : memref<1x128xf32, #tpu.memory_space<vmem>>, vector<1x128xf32>
    %7 = vector.broadcast %6 : vector<1x128xf32> to vector<128x128xf32>
    %8 = arith.addf %5, %7 : vector<128x128xf32>
    %cst_8 = arith.constant 0.000000e+00 : f32
    %9 = vector.broadcast %cst_8 : f32 to vector<128x128xf32>
    %10 = arith.maximumf %8, %9 : vector<128x128xf32>
    %11 = arith.truncf %10 : vector<128x128xf32> to vector<128x128xbf16>
    %c0_9 = arith.constant 0 : index
    %c0_10 = arith.constant 0 : index
    %12 = vector.load %arg5[%c0_9, %c0_10] : memref<128x128xbf16, #tpu.memory_space<vmem>>, vector<128x128xbf16>
    %cst_11 = arith.constant dense<0.000000e+00> : vector<128x128xf32>
    %13 = tpu.matmul %11, %12, %cst_11 {dimension_numbers = #tpu.dot_dimension_numbers<[1], [0], [0], [1], [0, 0, 1, 1], [], []>} : vector<128x128xbf16>, vector<128x128xbf16>, vector<128x128xf32> -> vector<128x128xf32>
    %c0_12 = arith.constant 0 : index
    %c0_13 = arith.constant 0 : index
    %14 = vector.load %arg6[%c0_12, %c0_13] : memref<1x128xf32, #tpu.memory_space<vmem>>, vector<1x128xf32>
    %15 = vector.broadcast %14 : vector<1x128xf32> to vector<128x128xf32>
    %16 = arith.addf %13, %15 : vector<128x128xf32>
    %cst_14 = arith.constant 0.000000e+00 : f32
    %17 = vector.broadcast %cst_14 : f32 to vector<128x128xf32>
    %18 = arith.maximumf %16, %17 : vector<128x128xf32>
    %19 = arith.truncf %18 : vector<128x128xf32> to vector<128x128xbf16>
    %c0_15 = arith.constant 0 : index
    %c0_16 = arith.constant 0 : index
    %20 = vector.load %arg7[%c0_15, %c0_16] : memref<128x128xbf16, #tpu.memory_space<vmem>>, vector<128x128xbf16>
    %cst_17 = arith.constant dense<0.000000e+00> : vector<128x128xf32>
    %21 = tpu.matmul %19, %20, %cst_17 {dimension_numbers = #tpu.dot_dimension_numbers<[1], [0], [0], [1], [0, 0, 1, 1], [], []>} : vector<128x128xbf16>, vector<128x128xbf16>, vector<128x128xf32> -> vector<128x128xf32>
    %c0_18 = arith.constant 0 : index
    %c0_19 = arith.constant 0 : index
    %22 = vector.load %arg8[%c0_18, %c0_19] : memref<1x128xf32, #tpu.memory_space<vmem>>, vector<1x128xf32>
    %23 = vector.broadcast %22 : vector<1x128xf32> to vector<128x128xf32>
    %24 = arith.addf %21, %23 : vector<128x128xf32>
    %cst_20 = arith.constant 0.000000e+00 : f32
    %25 = vector.broadcast %cst_20 : f32 to vector<128x128xf32>
    %26 = arith.maximumf %24, %25 : vector<128x128xf32>
    %c0_21 = arith.constant 0 : index
    %c0_22 = arith.constant 0 : index
    %27 = vector.load %arg9[%c0_21, %c0_22] : memref<128x128xf32, #tpu.memory_space<vmem>>, vector<128x128xf32>
    tpu.vector_store %arg9[%c0_21, %c0_22], %26 {strides = array<i32>} : memref<128x128xf32, #tpu.memory_space<vmem>>, vector<128x128xf32>,
    return
  }
  func.func @transform_0(%arg0: i32) -> (i32, i32) {
    %c0_i32 = arith.constant 0 : i32
    %c0_i32_0 = arith.constant 0 : i32
    return %arg0, %c0_i32 : i32, i32
  }
  func.func @transform_1(%arg0: i32) -> (i32, i32) {
    %c0_i32 = arith.constant 0 : i32
    %c0_i32_0 = arith.constant 0 : i32
    %c0_i32_1 = arith.constant 0 : i32
    return %c0_i32, %c0_i32_0 : i32, i32
  }
  func.func @transform_2(%arg0: i32) -> (i32, i32) {
    %c0_i32 = arith.constant 0 : i32
    %c0_i32_0 = arith.constant 0 : i32
    %c0_i32_1 = arith.constant 0 : i32
    return %c0_i32, %c0_i32_0 : i32, i32
  }
  func.func @transform_3(%arg0: i32) -> (i32, i32) {
    %c0_i32 = arith.constant 0 : i32
    %c0_i32_0 = arith.constant 0 : i32
    %c0_i32_1 = arith.constant 0 : i32
    return %c0_i32, %c0_i32_0 : i32, i32
  }
  func.func @transform_4(%arg0: i32) -> (i32, i32) {
    %c0_i32 = arith.constant 0 : i32
    %c0_i32_0 = arith.constant 0 : i32
    %c0_i32_1 = arith.constant 0 : i32
    return %c0_i32, %c0_i32_0 : i32, i32
  }
  func.func @transform_5(%arg0: i32) -> (i32, i32) {
    %c0_i32 = arith.constant 0 : i32
    %c0_i32_0 = arith.constant 0 : i32
    %c0_i32_1 = arith.constant 0 : i32
    return %c0_i32, %c0_i32_0 : i32, i32
  }
  func.func @transform_6(%arg0: i32) -> (i32, i32) {
    %c0_i32 = arith.constant 0 : i32
    %c0_i32_0 = arith.constant 0 : i32
    %c0_i32_1 = arith.constant 0 : i32
    return %c0_i32, %c0_i32_0 : i32, i32
  }
  func.func @transform_7(%arg0: i32) -> (i32, i32) {
    %c0_i32 = arith.constant 0 : i32
    %c0_i32_0 = arith.constant 0 : i32
    %c0_i32_1 = arith.constant 0 : i32
    return %c0_i32, %c0_i32_0 : i32, i32
  }
  func.func @transform_8(%arg0: i32) -> (i32, i32) {
    %c0_i32 = arith.constant 0 : i32
    %c0_i32_0 = arith.constant 0 : i32
    return %arg0, %c0_i32 : i32, i32
  }
}

</mosaic_0001>

<bundles_post_ra>
// kernel: tpu_custom_call.1
= control target key start
LH: loop header
LB: loop body
LE: loop exit
PB: predicated region body
PF: predicated region fallthrough
CT: control target
= control target key end

     0   :  { %6 = vsyncpa [#allocation3], 0  ;;  %s125_s0 = inlined_call_operand.hbm [shape: f32[8,128], index: 0, kind: input, shape index: {}]   ;;  %s126_s1 = inlined_call_operand.hbm [shape: f32[8,128], index: 1, kind: output, shape index: {}]  }
   0x1   :  { %7 = vsyncpa [#allocation4], 0  ;;  %s89_s6 = smov [#allocation2]   ;;  %s41_s10 = scalar_lea.hbm %s125_s0, 128 }
   0x2   :  { %s14_s7 = sshll.u32 %s89_s6, 4  ;;  %p42_p0 = scmp.ne.s32.totalorder %s125_s0, %s41_s10  ;;  %s15_s7 = int_to_ptr.vmem [resolvable:$true] %s14_s7 }
   0x3   :  { %p45_p1 = scmp.lt.u32.totalorder %s41_s10, %s125_s0 }
   0x5   :  { %p47_p2 = pnand %p45_p1, %p42_p0 }
   0x7   :  { %50 = shalt.err (!%p47_p2)
}
   0x8   :  { %s51_s15 = scalar_lea.vmem %s15_s7, 128  ;;  %p56_p4 = scmp.lt.s32.totalorder %s15_s7, %s15_s7 }
   0x9   :  { %p52_p3 = scmp.ne.s32.totalorder %s15_s7, %s51_s15  ;;  %p57_p5 = scmp.lt.s32.totalorder %s51_s15, %s51_s15 }
   0xb   :  { %p58_p6 = por %p57_p5, %p56_p4 }
   0xd   :  { %p59_p7 = pnand %p58_p6, %p52_p3 }
   0xf   :  { %62 = shalt.err (!%p59_p7)
}
  0x10   :  { %17 = dma.hbm_to_vmem [thread:$0]  %s125_s0, 128, %s15_s7, [#allocation3]  }
  0x11   :  { %85 = dma.done.wait [#allocation3], 128  }
  0x12   :  { %86 = vsyncadd [#allocation3], 4294967168  ;;  %s90_s18 = smov [#allocation5]   ;;  %v21_v0 = vld [vmem:[#allocation2] sm:$0xff] }
  0x13   :  { %s30_s19 = sshll.u32 %s90_s18, 4  ;;  %v22_v1 = vadd.f32 1.0, %v21_v0  ;;  %s31_s19 = int_to_ptr.vmem [resolvable:$true] %s30_s19 }
  0x14   :  { %s63_s20 = scalar_lea.vmem %s31_s19, 128  ;;  %p68_p9 = scmp.lt.s32.totalorder %s31_s19, %s31_s19 }
  0x15   :  { %23 = vst [vmem:[#allocation5] sm:$0xff] %v22_v1  ;;  %p64_p8 = scmp.ne.s32.totalorder %s31_s19, %s63_s20  ;;  %p69_p10 = scmp.lt.s32.totalorder %s63_s20, %s63_s20 }
  0x17   :  { %p70_p11 = por %p69_p10, %p68_p9 }
  0x19   :  { %p71_p12 = pnand %p70_p11, %p64_p8 }
  0x1b   :  { %74 = shalt.err (!%p71_p12)
}
  0x1c   :  { %s75_s23 = scalar_lea.hbm %s126_s1, 128 }
  0x1d   :  { %p76_p13 = scmp.ne.s32.totalorder %s126_s1, %s75_s23  ;;  %p79_p0 = scmp.lt.u32.totalorder %s75_s23, %s126_s1 }
  0x1f   :  { %p81_p1 = pnand %p79_p0, %p76_p13 }
  0x21   :  { %84 = shalt.err (!%p81_p1)
}
  0x22   :  { %33 = dma.vmem_to_hbm [thread:$0]  %s31_s19, 128, %s126_s1, [#allocation4]  }
  0x23   :  { %87 = dma.done.wait [#allocation4], 128  }
  0x24   :  { %88 = vsyncadd [#allocation4], 4294967168 }
  0x25   :  { %37 = vsyncpa [#allocation3], 1 }
  0x26   :  { %38 = vsyncpa [#allocation4], 1 }

// kernel: tpu_custom_call.1
= control target key start
LH: loop header
LB: loop body
LE: loop exit
PB: predicated region body
PF: predicated region fallthrough
CT: control target
= control target key end

     0   :  { %13 = vsyncpa [#allocation3], 0  ;;  %s1673_s0 = inlined_call_operand.hbm [shape: bf16[128,128], index: 0, kind: input, shape index: {}]   ;;  %s1674_s1 = inlined_call_operand.hbm [shape: bf16[128,128], index: 1, kind: input, shape index: {}]   ;;  %s1675_s2 = inlined_call_operand.hbm [shape: bf16[128,128], index: 2, kind: input, shape index: {}]   ;;  %s1676_s3 = inlined_call_operand.hbm [shape: f32[1,128], index: 3, kind: input, shape index: {}]   ;;  %s1677_s4 = inlined_call_operand.hbm [shape: bf16[128,128], index: 4, kind: input, shape index: {}]   ;;  %s1678_s5 = inlined_call_operand.hbm [shape: f32[1,128], index: 5, kind: input, shape index: {}]   ;;  %s1679_s6 = inlined_call_operand.hbm [shape: bf16[128,128], index: 6, kind: input, shape index: {}]   ;;  %s1680_s7 = inlined_call_operand.hbm [shape: f32[1,128], index: 7, kind: input, shape index: {}]   ;;  %s1681_s8 = inlined_call_operand.hbm [shape: f32[128,128], index: 8, kind: output, shape index: {}]  }
   0x1   :  { %14 = vsyncpa [#allocation6], 0 }
   0x2   :  { %15 = vsyncpa [#allocation9], 0 }
   0x3   :  { %16 = vsyncpa [#allocation12], 0 }
   0x4   :  { %17 = vsyncpa [#allocation15], 0 }
   0x5   :  { %18 = vsyncpa [#allocation4], 0  ;;  %s1470_s27 = smov [#allocation5]   ;;  %s1471_s29 = smov [#allocation8]  }
   0x6   :  { %s36_s28 = sshll.u32 %s1470_s27, 4  ;;  %s61_s30 = sshll.u32 %s1471_s29, 4  ;;  %s37_s28 = int_to_ptr.vmem [resolvable:$true] %s36_s28  ;;  %s1528_s30 = int_to_ptr.vmem [resolvable:$true] %s61_s30 }
   0x7   :  { %s1260_s11 = scalar_lea.hbm %s1674_s1, 1024 }
   0x8   :  { %p1261_p0 = scmp.ne.s32.totalorder %s1674_s1, %s1260_s11  ;;  %p1264_p1 = scmp.lt.u32.totalorder %s1260_s11, %s1674_s1 }
   0xa   :  { %p1266_p2 = pnand %p1264_p1, %p1261_p0 }
   0xc   :  { %1269 = shalt.err (!%p1266_p2)
}
   0xd   :  { %s1270_s16 = scalar_lea.vmem %s37_s28, 1024  ;;  %p1275_p4 = scmp.lt.s32.totalorder %s37_s28, %s37_s28 }
   0xe   :  { %p1271_p3 = scmp.ne.s32.totalorder %s37_s28, %s1270_s16  ;;  %p1276_p5 = scmp.lt.s32.totalorder %s1270_s16, %s1270_s16 }
  0x10   :  { %p1277_p6 = por %p1276_p5, %p1275_p4 }
  0x12   :  { %p1278_p7 = pnand %p1277_p6, %p1271_p3 }
  0x14   :  { %1281 = shalt.err (!%p1278_p7)
}
  0x15   :  { %s1472_s17 = smov 64   ;;  %s1473_s18 = smov 4  }
  0x16   :  { %42 = dma.hbm_to_vmem [thread:$0]  %s1674_s1, 1024, %s37_s28, [#allocation6], %s1472_s17, %s1472_s17, %s1473_s18  }
  0x17   :  { %s1282_s23 = scalar_lea.hbm %s1676_s3, 16 }
  0x18   :  { %p1283_p8 = scmp.ne.s32.totalorder %s1676_s3, %s1282_s23  ;;  %p1286_p9 = scmp.lt.u32.totalorder %s1282_s23, %s1676_s3 }
  0x1a   :  { %p1288_p10 = pnand %p1286_p9, %p1283_p8 }
  0x1c   :  { %1291 = shalt.err (!%p1288_p10)
}
  0x1d   :  { %s1292_s29 = scalar_lea.vmem %s1528_s30, 16  ;;  %s1296_s1 = scalar_lea.vmem %s1528_s30, 32 }
  0x1e   :  { %p1293_p11 = scmp.ne.s32.totalorder %s1528_s30, %s1292_s29  ;;  %p1297_p12 = scmp.lt.s32.totalorder %s1528_s30, %s1528_s30 }
  0x1f   :  { %p1298_p13 = scmp.lt.s32.totalorder %s1296_s1, %s1292_s29 }
  0x21   :  { %p1299_p0 = por %p1298_p13, %p1297_p12 }
  0x23   :  { %p1300_p1 = pnand %p1299_p0, %p1293_p11 }
  0x25   :  { %1303 = shalt.err (!%p1300_p1)
}
  0x26   :  { %64 = dma.hbm_to_vmem [thread:$0]  %s1676_s3, 16, %s1528_s30, [#allocation9]  }
  0x27   :  { %s1474_s10 = smov [#allocation11]   ;;  %s1475_s12 = smov [#allocation2]  }
  0x28   :  { %s83_s11 = sshll.u32 %s1474_s10, 4  ;;  %s24_s13 = sshll.u32 %s1475_s12, 4  ;;  %s84_s11 = int_to_ptr.vmem [resolvable:$true] %s83_s11  ;;  %s1563_s13 = int_to_ptr.vmem [resolvable:$true] %s24_s13 }
  0x29   :  { %s1304_s16 = scalar_lea.hbm %s1678_s5, 16 }
  0x2a   :  { %p1305_p2 = scmp.ne.s32.totalorder %s1678_s5, %s1304_s16  ;;  %p1308_p3 = scmp.lt.u32.totalorder %s1304_s16, %s1678_s5 }
  0x2c   :  { %p1310_p4 = pnand %p1308_p3, %p1305_p2 }
  0x2e   :  { %1313 = shalt.err (!%p1310_p4)
}
  0x2f   :  { %s1314_s3 = scalar_lea.vmem %s84_s11, 16  ;;  %s1318_s30 = scalar_lea.vmem %s84_s11, 32 }
  0x30   :  { %p1315_p5 = scmp.ne.s32.totalorder %s84_s11, %s1314_s3  ;;  %p1319_p6 = scmp.lt.s32.totalorder %s84_s11, %s84_s11 }
  0x31   :  { %p1320_p7 = scmp.lt.s32.totalorder %s1318_s30, %s1314_s3 }
  0x33   :  { %p1321_p8 = por %p1320_p7, %p1319_p6 }
  0x35   :  { %p1322_p9 = pnand %p1321_p8, %p1315_p5 }
  0x37   :  { %1325 = shalt.err (!%p1322_p9)
}
  0x38   :  { %86 = dma.hbm_to_vmem [thread:$0]  %s1678_s5, 16, %s84_s11, [#allocation12]  }
  0x39   :  { %s1326_s27 = scalar_lea.hbm %s1673_s0, 1024 }
  0x3a   :  { %p1327_p10 = scmp.ne.s32.totalorder %s1673_s0, %s1326_s27  ;;  %p1330_p11 = scmp.lt.u32.totalorder %s1326_s27, %s1673_s0 }
  0x3c   :  { %p1332_p12 = pnand %p1330_p11, %p1327_p10 }
  0x3e   :  { %1335 = shalt.err (!%p1332_p12)
}
  0x3f   :  { %s1336_s10 = scalar_lea.vmem %s1563_s13, 1024  ;;  %p1341_p0 = scmp.lt.s32.totalorder %s1563_s13, %s1563_s13 }
  0x40   :  { %p1337_p13 = scmp.ne.s32.totalorder %s1563_s13, %s1336_s10  ;;  %p1342_p1 = scmp.lt.s32.totalorder %s1336_s10, %s1336_s10 }
  0x42   :  { %p1343_p2 = por %p1342_p1, %p1341_p0 }
  0x44   :  { %p1344_p3 = pnand %p1343_p2, %p1337_p13 }
  0x46   :  { %1347 = shalt.err (!%p1344_p3)
}
  0x47   :  { %30 = dma.hbm_to_vmem [thread:$0]  %s1673_s0, 1024, %s1563_s13, [#allocation3], %s1472_s17, %s1472_s17, %s1473_s18  }
  0x48   :  { %s1476_s12 = smov [#allocation7]   ;;  %s1477_s15 = smov [#allocation10]  }
  0x49   :  { %s48_s14 = sshll.u32 %s1476_s12, 4  ;;  %s70_s16 = sshll.u32 %s1477_s15, 4  ;;  %s49_s14 = int_to_ptr.vmem [resolvable:$true] %s48_s14  ;;  %s1597_s16 = int_to_ptr.vmem [resolvable:$true] %s70_s16 }
  0x4a   :  { %s1348_s21 = scalar_lea.hbm %s1675_s2, 1024 }
  0x4b   :  { %p1349_p4 = scmp.ne.s32.totalorder %s1675_s2, %s1348_s21  ;;  %p1352_p5 = scmp.lt.u32.totalorder %s1348_s21, %s1675_s2 }
  0x4d   :  { %p1354_p6 = pnand %p1352_p5, %p1349_p4 }
  0x4f   :  { %1357 = shalt.err (!%p1354_p6)
}
  0x50   :  { %s1358_s0 = scalar_lea.vmem %s49_s14, 1024  ;;  %p1363_p8 = scmp.lt.s32.totalorder %s49_s14, %s49_s14 }
  0x51   :  { %p1359_p7 = scmp.ne.s32.totalorder %s49_s14, %s1358_s0  ;;  %p1364_p9 = scmp.lt.s32.totalorder %s1358_s0, %s1358_s0 }
  0x53   :  { %p1365_p10 = por %p1364_p9, %p1363_p8 }
  0x55   :  { %p1366_p11 = pnand %p1365_p10, %p1359_p7 }
  0x57   :  { %1369 = shalt.err (!%p1366_p11)
}
  0x58   :  { %54 = dma.hbm_to_vmem [thread:$0]  %s1675_s2, 1024, %s49_s14, [#allocation6], %s1472_s17, %s1472_s17, %s1473_s18  }
  0x59   :  { %s1370_s27 = scalar_lea.hbm %s1677_s4, 1024 }
  0x5a   :  { %p1371_p12 = scmp.ne.s32.totalorder %s1677_s4, %s1370_s27  ;;  %p1374_p13 = scmp.lt.u32.totalorder %s1370_s27, %s1677_s4 }
  0x5c   :  { %p1376_p0 = pnand %p1374_p13, %p1371_p12 }
  0x5e   :  { %1379 = shalt.err (!%p1376_p0)
}
  0x5f   :  { %s1380_s10 = scalar_lea.vmem %s1597_s16, 1024  ;;  %p1385_p2 = scmp.lt.s32.totalorder %s1597_s16, %s1597_s16 }
  0x60   :  { %p1381_p1 = scmp.ne.s32.totalorder %s1597_s16, %s1380_s10  ;;  %p1386_p3 = scmp.lt.s32.totalorder %s1380_s10, %s1380_s10 }
  0x62   :  { %p1387_p4 = por %p1386_p3, %p1385_p2 }
  0x64   :  { %p1388_p5 = pnand %p1387_p4, %p1381_p1 }
  0x66   :  { %1391 = shalt.err (!%p1388_p5)
}
  0x67   :  { %76 = dma.hbm_to_vmem [thread:$0]  %s1677_s4, 1024, %s1597_s16, [#allocation9], %s1472_s17, %s1472_s17, %s1473_s18  }
  0x68   :  { %s1478_s11 = smov [#allocation13]   ;;  %s1479_s14 = smov [#allocation14]  }
  0x69   :  { %s92_s12 = sshll.u32 %s1478_s11, 4  ;;  %s105_s15 = sshll.u32 %s1479_s14, 4  ;;  %s93_s12 = int_to_ptr.vmem [resolvable:$true] %s92_s12  ;;  %s106_s15 = int_to_ptr.vmem [resolvable:$true] %s105_s15 }
  0x6a   :  { %s1392_s21 = scalar_lea.hbm %s1679_s6, 1024 }
  0x6b   :  { %p1393_p6 = scmp.ne.s32.totalorder %s1679_s6, %s1392_s21  ;;  %p1396_p7 = scmp.lt.u32.totalorder %s1392_s21, %s1679_s6 }
  0x6d   :  { %p1398_p8 = pnand %p1396_p7, %p1393_p6 }
  0x6f   :  { %1401 = shalt.err (!%p1398_p8)
}
  0x70   :  { %s1402_s4 = scalar_lea.vmem %s93_s12, 1024  ;;  %p1407_p10 = scmp.lt.s32.totalorder %s93_s12, %s93_s12 }
  0x71   :  { %p1403_p9 = scmp.ne.s32.totalorder %s93_s12, %s1402_s4  ;;  %p1408_p11 = scmp.lt.s32.totalorder %s1402_s4, %s1402_s4 }
  0x73   :  { %p1409_p12 = por %p1408_p11, %p1407_p10 }
  0x75   :  { %p1410_p13 = pnand %p1409_p12, %p1403_p9 }
  0x77   :  { %1413 = shalt.err (!%p1410_p13)
}
  0x78   :  { %98 = dma.hbm_to_vmem [thread:$0]  %s1679_s6, 1024, %s93_s12, [#allocation12], %s1472_s17, %s1472_s17, %s1473_s18  }
  0x79   :  { %s1414_s25 = scalar_lea.hbm %s1680_s7, 16 }
  0x7a   :  { %p1415_p0 = scmp.ne.s32.totalorder %s1680_s7, %s1414_s25  ;;  %p1418_p1 = scmp.lt.u32.totalorder %s1414_s25, %s1680_s7 }
  0x7c   :  { %p1420_p2 = pnand %p1418_p1, %p1415_p0 }
  0x7e   :  { %1423 = shalt.err (!%p1420_p2)
}
  0x7f   :  { %s1424_s28 = scalar_lea.vmem %s106_s15, 16  ;;  %s1428_s9 = scalar_lea.vmem %s106_s15, 32 }
  0x80   :  { %p1425_p3 = scmp.ne.s32.totalorder %s106_s15, %s1424_s28  ;;  %p1429_p4 = scmp.lt.s32.totalorder %s106_s15, %s106_s15 }
  0x81   :  { %p1430_p5 = scmp.lt.s32.totalorder %s1428_s9, %s1424_s28 }
  0x83   :  { %p1431_p6 = por %p1430_p5, %p1429_p4 }
  0x85   :  { %p1432_p7 = pnand %p1431_p6, %p1425_p3 }
  0x87   :  { %1435 = shalt.err (!%p1432_p7)
}
  0x88   :  { %108 = dma.hbm_to_vmem [thread:$0]  %s1680_s7, 16, %s106_s15, [#allocation15]  }
  0x89   :  { %1458 = dma.done.wait [#allocation3], 1024  }
  0x8a   :  { %1459 = vsyncadd [#allocation3], 4294966272 }
  0x8b   :  { %1460 = dma.done.wait [#allocation6], 2048  }
  0x8c   :  { %1461 = vsyncadd [#allocation6], 4294965248 }
  0x8d   :  { %1462 = dma.done.wait [#allocation9], 1040  }
  0x8e   :  { %1463 = vsyncadd [#allocation9], 4294966256 }
  0x8f   :  { %1464 = dma.done.wait [#allocation12], 1040  }
  0x90   :  { %1465 = vsyncadd [#allocation12], 4294966256 }
  0x91   :  { %1466 = dma.done.wait [#allocation15], 16  }
  0x92   :  { %1467 = vsyncadd [#allocation15], 4294967280  ;;  %v1220_v0 = vld [vmem:[#allocation5] sm:$0xff]   ;;  %v1221_v1 = vld [vmem:[#allocation5 + $0x8] sm:$0xff]   ;;  %s1480_s7 = smov [#allocation16]  }
  0x93   :  { %1079 = vmatprep.subr.bf16.mxu0 %v1220_v0  ;;  %v1222_v2 = vld [vmem:[#allocation5 + $0x10] sm:$0xff]   ;;  %v1223_v3 = vld [vmem:[#allocation5 + $0x18] sm:$0xff]   ;;  %v1228_v4 = vld [vmem:[#allocation2] sm:$0xff]   ;;  %s956_s18 = sshll.u32 %s1480_s7, 4  ;;  %s957_s18 = int_to_ptr.vmem [resolvable:$true] %s956_s18 }
  0x94   :  { %1080 = vmatpush3.bf16.msra.mxu0 %v1220_v0  ;;  %1095 = vmatprep.mubr.bf16.mxu0 %v1228_v4  ;;  %v1224_v5 = vld [vmem:[#allocation5 + $0x20] sm:$0xff]   ;;  %v1225_v6 = vld [vmem:[#allocation5 + $0x28] sm:$0xff]   ;;  %v1226_v9 = vld [vmem:[#allocation5 + $0x30] sm:$0xff]   ;;  %s1436_s10 = scalar_lea.vmem %s957_s18, 2048  ;;  %p1441_p9 = scmp.lt.s32.totalorder %s957_s18, %s957_s18 }
  0x95   :  { %1081 = vmatprep.subr.bf16.mxu0 %v1221_v1  ;;  %v1236_v7 = vld [vmem:[#allocation7] sm:$0xff]   ;;  %v1237_v8 = vld [vmem:[#allocation7 + $0x8] sm:$0xff]   ;;  %v1238_v10 = vld [vmem:[#allocation7 + $0x10] sm:$0xff]   ;;  %p1437_p8 = scmp.ne.s32.totalorder %s957_s18, %s1436_s10  ;;  %p1442_p10 = scmp.lt.s32.totalorder %s1436_s10, %s1436_s10 }
  0x96   :  { %1111 = vmatprep.subr.bf16.mxu1 %v1236_v7  ;;  %v1227_v11 = vld [vmem:[#allocation5 + $0x38] sm:$0xff]   ;;  %v1240_v13 = vld [vmem:[#allocation7 + $0x20] sm:$0xff]   ;;  %v1229_v14 = vld [vmem:[#allocation2 + $0x8] sm:$0xff]  }
  0x97   :  { %1112 = vmatpush3.bf16.msra.mxu1 %v1236_v7  ;;  %v1239_v12 = vld [vmem:[#allocation7 + $0x18] sm:$0xff]   ;;  %v1230_v15 = vld [vmem:[#allocation2 + $0x10] sm:$0xff]   ;;  %v1241_v16 = vld [vmem:[#allocation7 + $0x28] sm:$0xff]   ;;  %p1443_p11 = por %p1442_p10, %p1441_p9 }
  0x98   :  { %1082 = vmatpush3.bf16.msra.mxu0 %v1221_v1  ;;  %1113 = vmatprep.subr.bf16.mxu1 %v1237_v8  ;;  %v1242_v17 = vld [vmem:[#allocation7 + $0x30] sm:$0xff]   ;;  %v1231_v18 = vld [vmem:[#allocation2 + $0x18] sm:$0xff]   ;;  %v1232_v19 = vld [vmem:[#allocation2 + $0x20] sm:$0xff]  }
  0x99   :  { %1083 = vmatprep.subr.bf16.mxu0 %v1222_v2  ;;  %v1233_v20 = vld [vmem:[#allocation2 + $0x28] sm:$0xff]   ;;  %v1234_v21 = vld [vmem:[#allocation2 + $0x30] sm:$0xff]   ;;  %v1235_v22 = vld [vmem:[#allocation2 + $0x38] sm:$0xff]   ;;  %p1444_p12 = pnand %p1443_p11, %p1437_p8 }
  0x9a   :  { %v1243_v23 = vld [vmem:[#allocation7 + $0x38] sm:$0xff]   ;;  %v1244_v24 = vld [vmem:[#allocation10] sm:$0xff]   ;;  %v1245_v25 = vld [vmem:[#allocation10 + $0x8] sm:$0xff]  }
  0x9b   :  { %1114 = vmatpush3.bf16.msra.mxu1 %v1237_v8  ;;  %v1246_v26 = vld [vmem:[#allocation10 + $0x10] sm:$0xff]   ;;  %v1247_v27 = vld [vmem:[#allocation10 + $0x18] sm:$0xff]   ;;  %v1248_v28 = vld [vmem:[#allocation10 + $0x20] sm:$0xff]  }
  0x9c   :  { %1084 = vmatpush3.bf16.msra.mxu0 %v1222_v2  ;;  %1115 = vmatprep.subr.bf16.mxu1 %v1238_v10  ;;  %v1249_v29 = vld [vmem:[#allocation10 + $0x28] sm:$0xff]   ;;  %v1250_v54 = vld [vmem:[#allocation10 + $0x30] sm:$0xff]   ;;  %v1251_v55 = vld [vmem:[#allocation10 + $0x38] sm:$0xff]  }
  0x9d   :  { %1085 = vmatprep.subr.bf16.mxu0 %v1223_v3  ;;  %v1252_v56 = vld [vmem:[#allocation13] sm:$0xff]   ;;  %v1253_v57 = vld [vmem:[#allocation13 + $0x8] sm:$0xff]   ;;  %v1254_v58 = vld [vmem:[#allocation13 + $0x10] sm:$0xff]  }
  0x9e   :  { %v1255_v59 = vld [vmem:[#allocation13 + $0x18] sm:$0xff]   ;;  %v1256_v60 = vld [vmem:[#allocation13 + $0x20] sm:$0xff]   ;;  %v1257_v61 = vld [vmem:[#allocation13 + $0x28] sm:$0xff]  }
  0x9f   :  { %1116 = vmatpush3.bf16.msra.mxu1 %v1238_v10  ;;  %v988_v62 = vld [vmem:[#allocation8] ss:$0 sm:$0xff] }
  0xa0   :  { %1086 = vmatpush3.bf16.msra.mxu0 %v1223_v3  ;;  %1117 = vmatprep.subr.bf16.mxu1 %v1239_v12 }
  0xa1   :  { %1087 = vmatprep.subr.bf16.mxu0 %v1224_v5 }
  0xa3   :  { %1118 = vmatpush3.bf16.msra.mxu1 %v1239_v12 }
  0xa4   :  { %1088 = vmatpush3.bf16.msra.mxu0 %v1224_v5  ;;  %1119 = vmatprep.subr.bf16.mxu1 %v1240_v13 }
  0xa5   :  { %1089 = vmatprep.subr.bf16.mxu0 %v1225_v6 }
  0xa7   :  { %1120 = vmatpush3.bf16.msra.mxu1 %v1240_v13 }
  0xa8   :  { %1090 = vmatpush3.bf16.msra.mxu0 %v1225_v6  ;;  %1121 = vmatprep.subr.bf16.mxu1 %v1241_v16 }
  0xa9   :  { %1091 = vmatprep.subr.bf16.mxu0 %v1226_v9 }
  0xab   :  { %1122 = vmatpush3.bf16.msra.mxu1 %v1241_v16 }
  0xac   :  { %1092 = vmatpush3.bf16.msra.mxu0 %v1226_v9  ;;  %1123 = vmatprep.subr.bf16.mxu1 %v1242_v17 }
  0xad   :  { %1093 = vmatprep.subr.bf16.mxu0 %v1227_v11 }
  0xaf   :  { %1124 = vmatpush3.bf16.msra.mxu1 %v1242_v17 }
  0xb0   :  { %1094 = vmatpush3.bf16.msra.mxu0 %v1227_v11  ;;  %1125 = vmatprep.subr.bf16.mxu1 %v1243_v23 }
  0xb1   :  { %1143 = vmatprep.subr.bf16.mxu0 %v1244_v24 }
  0xb3   :  { %1096 = vmatmul.mubr.bf16.vlgmr.msra.gmra.mrb[0].mxu0 %v1229_v14  ;;  %1126 = vmatpush3.bf16.msra.mxu1 %v1243_v23 }
  0xb4   :  { %1099 = vmatprep.mubr.bf16.mxu0 %v1230_v15  ;;  %1144 = vmatpush3.bf16.msra.mxu0 %v1244_v24 }
  0xb5   :  { %1145 = vmatprep.subr.bf16.mxu0 %v1245_v25  ;;  %1175 = vmatprep.subr.bf16.mxu1 %v1252_v56 }
  0xb8   :  { %1146 = vmatpush3.bf16.msra.mxu0 %v1245_v25 }
  0xb9   :  { %1147 = vmatprep.subr.bf16.mxu0 %v1246_v26 }
  0xbb   :  { %1100 = vmatmul.mubr.bf16.gmra.mrb[4].mxu0 %v1231_v18 }
  0xbc   :  { %1103 = vmatprep.mubr.bf16.mxu0 %v1232_v19  ;;  %1148 = vmatpush3.bf16.msra.mxu0 %v1246_v26 }
  0xbd   :  { %1149 = vmatprep.subr.bf16.mxu0 %v1247_v27 }
  0xc0   :  { %1150 = vmatpush3.bf16.msra.mxu0 %v1247_v27 }
  0xc1   :  { %1151 = vmatprep.subr.bf16.mxu0 %v1248_v28 }
  0xc3   :  { %1104 = vmatmul.mubr.bf16.gmra.mrb[8].mxu0 %v1233_v20 }
  0xc4   :  { %1107 = vmatprep.mubr.bf16.mxu0 %v1234_v21  ;;  %1152 = vmatpush3.bf16.msra.mxu0 %v1248_v28 }
  0xc5   :  { %1153 = vmatprep.subr.bf16.mxu0 %v1249_v29 }
  0xc8   :  { %1154 = vmatpush3.bf16.msra.mxu0 %v1249_v29 }
  0xc9   :  { %1155 = vmatprep.subr.bf16.mxu0 %v1250_v54 }
  0xcb   :  { %1108 = vmatmul.mubr.bf16.gmra.mrb[12].mxu0 %v1235_v22 }
  0xcc   :  { %1156 = vmatpush3.bf16.msra.mxu0 %v1250_v54 }
  0xcd   :  { %1157 = vmatprep.subr.bf16.mxu0 %v1251_v55 }
  0xd0   :  { %1158 = vmatpush3.bf16.msra.mxu0 %v1251_v55  ;;  %v1258_v55 = vld [vmem:[#allocation13 + $0x30] sm:$0xff]  }
 0x186   :  { %v1097_v30 = vpop.f32.mrb[0].mxu0 }
 0x187   :  { %v296_v31 = vpop.f32.mrb[1].mxu0 }
 0x188   :  { %v1098_v32 = vpop.f32.mrb[2].mxu0 }
 0x189   :  { %v360_v33 = vpack.c.bf16 %v1098_v32, %v1097_v30  ;;  %v299_v34 = vpop.f32.mrb[3].mxu0 }
 0x18a   :  { %v359_v35 = vpack.c.bf16 %v299_v34, %v296_v31 }
 0x18c   :  { %1127 = vmatprep.mubr.bf16.mxu1 %v359_v35 }
 0x18d   :  { %1128 = vmatmul.mubr.bf16.vlgmr.msra.gmra.mrb[0].mxu1 %v360_v33 }
 0x18e   :  { %v1101_v36 = vpop.f32.mrb[4].mxu0  ;;  %1176 = vmatpush3.bf16.msra.mxu1 %v1252_v56  ;;  %v1259_v56 = vld [vmem:[#allocation13 + $0x38] sm:$0xff]  }
 0x18f   :  { %v312_v37 = vpop.f32.mrb[5].mxu0  ;;  %1177 = vmatprep.subr.bf16.mxu1 %v1253_v57 }
 0x190   :  { %v1102_v38 = vpop.f32.mrb[6].mxu0 }
 0x191   :  { %v362_v39 = vpack.c.bf16 %v1102_v38, %v1101_v36  ;;  %v315_v40 = vpop.f32.mrb[7].mxu0 }
 0x192   :  { %v361_v41 = vpack.c.bf16 %v315_v40, %v312_v37  ;;  %1178 = vmatpush3.bf16.msra.mxu1 %v1253_v57  ;;  %v997_v57 = vld [vmem:[#allocation11] ss:$0 sm:$0xff] }
 0x193   :  { %1179 = vmatprep.subr.bf16.mxu1 %v1254_v58 }
 0x194   :  { %1131 = vmatprep.mubr.bf16.mxu1 %v361_v41 }
 0x195   :  { %1132 = vmatmul.mubr.bf16.gmra.mrb[4].mxu1 %v362_v39 }
 0x196   :  { %v1105_v42 = vpop.f32.mrb[8].mxu0  ;;  %1180 = vmatpush3.bf16.msra.mxu1 %v1254_v58 }
 0x197   :  { %v328_v43 = vpop.f32.mrb[9].mxu0  ;;  %1181 = vmatprep.subr.bf16.mxu1 %v1255_v59 }
 0x198   :  { %v1106_v44 = vpop.f32.mrb[10].mxu0 }
 0x199   :  { %v364_v45 = vpack.c.bf16 %v1106_v44, %v1105_v42  ;;  %v331_v46 = vpop.f32.mrb[11].mxu0 }
 0x19a   :  { %v363_v47 = vpack.c.bf16 %v331_v46, %v328_v43  ;;  %1182 = vmatpush3.bf16.msra.mxu1 %v1255_v59 }
 0x19b   :  { %1183 = vmatprep.subr.bf16.mxu1 %v1256_v60 }
 0x19c   :  { %1135 = vmatprep.mubr.bf16.mxu1 %v363_v47 }
 0x19d   :  { %1136 = vmatmul.mubr.bf16.gmra.mrb[8].mxu1 %v364_v45 }
 0x19e   :  { %v1109_v48 = vpop.f32.mrb[12].mxu0  ;;  %1184 = vmatpush3.bf16.msra.mxu1 %v1256_v60 }
 0x19f   :  { %v344_v49 = vpop.f32.mrb[13].mxu0  ;;  %1185 = vmatprep.subr.bf16.mxu1 %v1257_v61 }
 0x1a0   :  { %v1110_v50 = vpop.f32.mrb[14].mxu0 }
 0x1a1   :  { %v366_v51 = vpack.c.bf16 %v1110_v50, %v1109_v48  ;;  %v347_v52 = vpop.f32.mrb[15].mxu0 }
 0x1a2   :  { %v365_v53 = vpack.c.bf16 %v347_v52, %v344_v49  ;;  %1186 = vmatpush3.bf16.msra.mxu1 %v1257_v61 }
 0x1a3   :  { %1187 = vmatprep.subr.bf16.mxu1 %v1258_v55 }
 0x1a4   :  { %1139 = vmatprep.mubr.bf16.mxu1 %v365_v53 }
 0x1a5   :  { %1140 = vmatmul.mubr.bf16.gmra.mrb[12].mxu1 %v366_v51 }
 0x1a6   :  { %1188 = vmatpush3.bf16.msra.mxu1 %v1258_v55 }
 0x1a7   :  { %1189 = vmatprep.subr.bf16.mxu1 %v1259_v56 }
 0x1aa   :  { %1190 = vmatpush3.bf16.msra.mxu1 %v1259_v56 }
 0x260   :  { %v1129_v63 = vpop.f32.mrb[0].mxu1 }
 0x261   :  { %v481_v0 = vadd.f32 %v1129_v63, %v988_v62  ;;  %v472_v1 = vpop.f32.mrb[1].mxu1 }
 0x262   :  { %v473_v2 = vadd.f32 %v988_v62, %v472_v1  ;;  %v1130_v3 = vpop.f32.mrb[2].mxu1 }
 0x263   :  { %v484_v4 = vadd.f32 %v1130_v3, %v988_v62  ;;  %v475_v5 = vpop.f32.mrb[3].mxu1  ;;  %v537_v7 = vmax.f32 %v481_v0, 0.0 }
 0x264   :  { %v476_v6 = vadd.f32 %v988_v62, %v475_v5  ;;  %v535_v9 = vmax.f32 %v473_v2, 0.0 }
 0x265   :  { %v538_v8 = vmax.f32 %v484_v4, 0.0 }
 0x266   :  { %v536_v10 = vmax.f32 %v476_v6, 0.0 }
 0x267   :  { %v552_v11 = vpack.c.bf16 %v538_v8, %v537_v7 }
 0x268   :  { %v551_v12 = vpack.c.bf16 %v536_v10, %v535_v9  ;;  %v1133_v13 = vpop.f32.mrb[4].mxu1 }
 0x269   :  { %v497_v14 = vadd.f32 %v1133_v13, %v988_v62  ;;  %v488_v15 = vpop.f32.mrb[5].mxu1 }
 0x26a   :  { %v489_v16 = vadd.f32 %v988_v62, %v488_v15  ;;  %v1134_v17 = vpop.f32.mrb[6].mxu1  ;;  %1159 = vmatprep.mubr.bf16.mxu0 %v551_v12 }
 0x26b   :  { %v500_v18 = vadd.f32 %v1134_v17, %v988_v62  ;;  %v491_v19 = vpop.f32.mrb[7].mxu1  ;;  %1160 = vmatmul.mubr.bf16.vlgmr.msra.gmra.mrb[16].mxu0 %v552_v11  ;;  %v541_v21 = vmax.f32 %v497_v14, 0.0 }
 0x26c   :  { %v492_v20 = vadd.f32 %v988_v62, %v491_v19  ;;  %v539_v23 = vmax.f32 %v489_v16, 0.0 }
 0x26d   :  { %v542_v22 = vmax.f32 %v500_v18, 0.0 }
 0x26e   :  { %v540_v24 = vmax.f32 %v492_v20, 0.0 }
 0x26f   :  { %v554_v25 = vpack.c.bf16 %v542_v22, %v541_v21 }
 0x270   :  { %v553_v26 = vpack.c.bf16 %v540_v24, %v539_v23  ;;  %v1137_v27 = vpop.f32.mrb[8].mxu1 }
 0x271   :  { %v513_v28 = vadd.f32 %v1137_v27, %v988_v62  ;;  %v504_v29 = vpop.f32.mrb[9].mxu1 }
 0x272   :  { %v505_v30 = vadd.f32 %v988_v62, %v504_v29  ;;  %v1138_v31 = vpop.f32.mrb[10].mxu1  ;;  %1163 = vmatprep.mubr.bf16.mxu0 %v553_v26 }
 0x273   :  { %v516_v32 = vadd.f32 %v1138_v31, %v988_v62  ;;  %v507_v33 = vpop.f32.mrb[11].mxu1  ;;  %1164 = vmatmul.mubr.bf16.gmra.mrb[20].mxu0 %v554_v25  ;;  %v545_v35 = vmax.f32 %v513_v28, 0.0 }
 0x274   :  { %v508_v34 = vadd.f32 %v988_v62, %v507_v33  ;;  %v543_v37 = vmax.f32 %v505_v30, 0.0 }
 0x275   :  { %v546_v36 = vmax.f32 %v516_v32, 0.0 }
 0x276   :  { %v544_v38 = vmax.f32 %v508_v34, 0.0 }
 0x277   :  { %v556_v39 = vpack.c.bf16 %v546_v36, %v545_v35 }
 0x278   :  { %v555_v40 = vpack.c.bf16 %v544_v38, %v543_v37  ;;  %v1141_v41 = vpop.f32.mrb[12].mxu1 }
 0x279   :  { %v529_v42 = vadd.f32 %v1141_v41, %v988_v62  ;;  %v520_v43 = vpop.f32.mrb[13].mxu1 }
 0x27a   :  { %v521_v44 = vadd.f32 %v988_v62, %v520_v43  ;;  %v1142_v45 = vpop.f32.mrb[14].mxu1  ;;  %1167 = vmatprep.mubr.bf16.mxu0 %v555_v40 }
 0x27b   :  { %v532_v46 = vadd.f32 %v1142_v45, %v988_v62  ;;  %v523_v47 = vpop.f32.mrb[15].mxu1  ;;  %1168 = vmatmul.mubr.bf16.gmra.mrb[24].mxu0 %v556_v39  ;;  %v549_v49 = vmax.f32 %v529_v42, 0.0 }
 0x27c   :  { %v524_v48 = vadd.f32 %v988_v62, %v523_v47  ;;  %v547_v51 = vmax.f32 %v521_v44, 0.0 }
 0x27d   :  { %v550_v50 = vmax.f32 %v532_v46, 0.0 }
 0x27e   :  { %v548_v52 = vmax.f32 %v524_v48, 0.0 }
 0x27f   :  { %v558_v53 = vpack.c.bf16 %v550_v50, %v549_v49  ;;  %v1006_v50 = vld [vmem:[#allocation14] ss:$0 sm:$0xff] }
 0x280   :  { %v557_v54 = vpack.c.bf16 %v548_v52, %v547_v51 }
 0x282   :  { %1171 = vmatprep.mubr.bf16.mxu0 %v557_v54 }
 0x283   :  { %1172 = vmatmul.mubr.bf16.gmra.mrb[28].mxu0 %v558_v53 }
 0x33e   :  { %v1161_v58 = vpop.f32.mrb[16].mxu0 }
 0x33f   :  { %v673_v59 = vadd.f32 %v1161_v58, %v997_v57  ;;  %v664_v60 = vpop.f32.mrb[17].mxu0 }
 0x340   :  { %v665_v61 = vadd.f32 %v997_v57, %v664_v60  ;;  %v1162_v62 = vpop.f32.mrb[18].mxu0 }
 0x341   :  { %v676_v63 = vadd.f32 %v1162_v62, %v997_v57  ;;  %v667_v0 = vpop.f32.mrb[19].mxu0  ;;  %v729_v2 = vmax.f32 %v673_v59, 0.0 }
 0x342   :  { %v668_v1 = vadd.f32 %v997_v57, %v667_v0  ;;  %v727_v4 = vmax.f32 %v665_v61, 0.0 }
 0x343   :  { %v730_v3 = vmax.f32 %v676_v63, 0.0 }
 0x344   :  { %v728_v5 = vmax.f32 %v668_v1, 0.0 }
 0x345   :  { %v744_v6 = vpack.c.bf16 %v730_v3, %v729_v2 }
 0x346   :  { %v743_v7 = vpack.c.bf16 %v728_v5, %v727_v4  ;;  %v1165_v8 = vpop.f32.mrb[20].mxu0 }
 0x347   :  { %v689_v9 = vadd.f32 %v1165_v8, %v997_v57  ;;  %v680_v10 = vpop.f32.mrb[21].mxu0 }
 0x348   :  { %v681_v11 = vadd.f32 %v997_v57, %v680_v10  ;;  %v1166_v12 = vpop.f32.mrb[22].mxu0  ;;  %1191 = vmatprep.mubr.bf16.mxu1 %v743_v7 }
 0x349   :  { %v692_v13 = vadd.f32 %v1166_v12, %v997_v57  ;;  %v683_v14 = vpop.f32.mrb[23].mxu0  ;;  %1192 = vmatmul.mubr.bf16.vlgmr.msra.gmra.mrb[16].mxu1 %v744_v6  ;;  %v733_v16 = vmax.f32 %v689_v9, 0.0 }
 0x34a   :  { %v684_v15 = vadd.f32 %v997_v57, %v683_v14  ;;  %v731_v18 = vmax.f32 %v681_v11, 0.0 }
 0x34b   :  { %v734_v17 = vmax.f32 %v692_v13, 0.0 }
 0x34c   :  { %v732_v19 = vmax.f32 %v684_v15, 0.0 }
 0x34d   :  { %v746_v20 = vpack.c.bf16 %v734_v17, %v733_v16 }
 0x34e   :  { %v745_v21 = vpack.c.bf16 %v732_v19, %v731_v18  ;;  %v1169_v22 = vpop.f32.mrb[24].mxu0 }
 0x34f   :  { %v705_v23 = vadd.f32 %v1169_v22, %v997_v57  ;;  %v696_v24 = vpop.f32.mrb[25].mxu0 }
 0x350   :  { %v697_v25 = vadd.f32 %v997_v57, %v696_v24  ;;  %v1170_v26 = vpop.f32.mrb[26].mxu0  ;;  %1195 = vmatprep.mubr.bf16.mxu1 %v745_v21 }
 0x351   :  { %v708_v27 = vadd.f32 %v1170_v26, %v997_v57  ;;  %v699_v28 = vpop.f32.mrb[27].mxu0  ;;  %1196 = vmatmul.mubr.bf16.gmra.mrb[20].mxu1 %v746_v20  ;;  %v737_v30 = vmax.f32 %v705_v23, 0.0 }
 0x352   :  { %v700_v29 = vadd.f32 %v997_v57, %v699_v28  ;;  %v735_v32 = vmax.f32 %v697_v25, 0.0 }
 0x353   :  { %v738_v31 = vmax.f32 %v708_v27, 0.0 }
 0x354   :  { %v736_v33 = vmax.f32 %v700_v29, 0.0 }
 0x355   :  { %v748_v34 = vpack.c.bf16 %v738_v31, %v737_v30 }
 0x356   :  { %v747_v35 = vpack.c.bf16 %v736_v33, %v735_v32  ;;  %v1173_v36 = vpop.f32.mrb[28].mxu0 }
 0x357   :  { %v721_v37 = vadd.f32 %v1173_v36, %v997_v57  ;;  %v712_v38 = vpop.f32.mrb[29].mxu0 }
 0x358   :  { %v713_v39 = vadd.f32 %v997_v57, %v712_v38  ;;  %v1174_v40 = vpop.f32.mrb[30].mxu0  ;;  %1199 = vmatprep.mubr.bf16.mxu1 %v747_v35 }
 0x359   :  { %v724_v41 = vadd.f32 %v1174_v40, %v997_v57  ;;  %v715_v42 = vpop.f32.mrb[31].mxu0  ;;  %1200 = vmatmul.mubr.bf16.gmra.mrb[24].mxu1 %v748_v34  ;;  %v741_v44 = vmax.f32 %v721_v37, 0.0 }
 0x35a   :  { %v716_v43 = vadd.f32 %v997_v57, %v715_v42  ;;  %v739_v46 = vmax.f32 %v713_v39, 0.0 }
 0x35b   :  { %v742_v45 = vmax.f32 %v724_v41, 0.0 }
 0x35c   :  { %v740_v47 = vmax.f32 %v716_v43, 0.0 }
 0x35d   :  { %v750_v48 = vpack.c.bf16 %v742_v45, %v741_v44 }
 0x35e   :  { %v749_v49 = vpack.c.bf16 %v740_v47, %v739_v46 }
 0x360   :  { %1203 = vmatprep.mubr.bf16.mxu1 %v749_v49 }
 0x361   :  { %1204 = vmatmul.mubr.bf16.gmra.mrb[28].mxu1 %v750_v48 }
 0x41c   :  { %v1193_v51 = vpop.f32.mrb[16].mxu1 }
 0x41d   :  { %v865_v52 = vadd.f32 %v1193_v51, %v1006_v50  ;;  %v856_v53 = vpop.f32.mrb[17].mxu1 }
 0x41e   :  { %v857_v54 = vadd.f32 %v1006_v50, %v856_v53  ;;  %v1194_v55 = vpop.f32.mrb[18].mxu1 }
 0x41f   :  { %v921_v56 = vmax.f32 %v865_v52, 0.0  ;;  %v868_v58 = vadd.f32 %v1194_v55, %v1006_v50  ;;  %v859_v59 = vpop.f32.mrb[19].mxu1 }
 0x420   :  { %v919_v60 = vmax.f32 %v857_v54, 0.0  ;;  %v860_v61 = vadd.f32 %v1006_v50, %v859_v59 }
 0x421   :  { %937 = vst [vmem:[#allocation16 + $0x10] sm:$0xff] %v921_v56  ;;  %v922_v57 = vmax.f32 %v868_v58, 0.0 }
 0x422   :  { %935 = vst [vmem:[#allocation16] sm:$0xff] %v919_v60  ;;  %v920_v62 = vmax.f32 %v860_v61, 0.0 }
 0x423   :  { %938 = vst [vmem:[#allocation16 + $0x18] sm:$0xff] %v922_v57 }
 0x424   :  { %936 = vst [vmem:[#allocation16 + $0x8] sm:$0xff] %v920_v62  ;;  %v1197_v63 = vpop.f32.mrb[20].mxu1 }
 0x425   :  { %v881_v0 = vadd.f32 %v1197_v63, %v1006_v50  ;;  %v872_v1 = vpop.f32.mrb[21].mxu1 }
 0x426   :  { %v873_v2 = vadd.f32 %v1006_v50, %v872_v1  ;;  %v1198_v3 = vpop.f32.mrb[22].mxu1 }
 0x427   :  { %v925_v4 = vmax.f32 %v881_v0, 0.0  ;;  %v884_v5 = vadd.f32 %v1198_v3, %v1006_v50  ;;  %v875_v6 = vpop.f32.mrb[23].mxu1 }
 0x428   :  { %v923_v7 = vmax.f32 %v873_v2, 0.0  ;;  %v876_v8 = vadd.f32 %v1006_v50, %v875_v6 }
 0x429   :  { %941 = vst [vmem:[#allocation16 + $0x30] sm:$0xff] %v925_v4  ;;  %v926_v9 = vmax.f32 %v884_v5, 0.0 }
 0x42a   :  { %939 = vst [vmem:[#allocation16 + $0x20] sm:$0xff] %v923_v7  ;;  %v924_v10 = vmax.f32 %v876_v8, 0.0 }
 0x42b   :  { %942 = vst [vmem:[#allocation16 + $0x38] sm:$0xff] %v926_v9 }
 0x42c   :  { %940 = vst [vmem:[#allocation16 + $0x28] sm:$0xff] %v924_v10  ;;  %v1201_v11 = vpop.f32.mrb[24].mxu1 }
 0x42d   :  { %v897_v12 = vadd.f32 %v1201_v11, %v1006_v50  ;;  %v888_v13 = vpop.f32.mrb[25].mxu1 }
 0x42e   :  { %v889_v14 = vadd.f32 %v1006_v50, %v888_v13  ;;  %v1202_v15 = vpop.f32.mrb[26].mxu1 }
 0x42f   :  { %v929_v16 = vmax.f32 %v897_v12, 0.0  ;;  %v900_v17 = vadd.f32 %v1202_v15, %v1006_v50  ;;  %v891_v18 = vpop.f32.mrb[27].mxu1 }
 0x430   :  { %v927_v19 = vmax.f32 %v889_v14, 0.0  ;;  %v892_v20 = vadd.f32 %v1006_v50, %v891_v18 }
 0x431   :  { %945 = vst [vmem:[#allocation16 + $0x50] sm:$0xff] %v929_v16  ;;  %v930_v21 = vmax.f32 %v900_v17, 0.0 }
 0x432   :  { %943 = vst [vmem:[#allocation16 + $0x40] sm:$0xff] %v927_v19  ;;  %v928_v22 = vmax.f32 %v892_v20, 0.0 }
 0x433   :  { %946 = vst [vmem:[#allocation16 + $0x58] sm:$0xff] %v930_v21 }
 0x434   :  { %944 = vst [vmem:[#allocation16 + $0x48] sm:$0xff] %v928_v22  ;;  %v1205_v23 = vpop.f32.mrb[28].mxu1 }
 0x435   :  { %v913_v24 = vadd.f32 %v1205_v23, %v1006_v50  ;;  %v904_v25 = vpop.f32.mrb[29].mxu1 }
 0x436   :  { %v905_v26 = vadd.f32 %v1006_v50, %v904_v25  ;;  %v1206_v27 = vpop.f32.mrb[30].mxu1 }
 0x437   :  { %v933_v28 = vmax.f32 %v913_v24, 0.0  ;;  %v916_v29 = vadd.f32 %v1206_v27, %v1006_v50  ;;  %v907_v30 = vpop.f32.mrb[31].mxu1 }
 0x438   :  { %v931_v31 = vmax.f32 %v905_v26, 0.0  ;;  %v908_v32 = vadd.f32 %v1006_v50, %v907_v30 }
 0x439   :  { %949 = vst [vmem:[#allocation16 + $0x70] sm:$0xff] %v933_v28  ;;  %v934_v33 = vmax.f32 %v916_v29, 0.0 }
 0x43a   :  { %947 = vst [vmem:[#allocation16 + $0x60] sm:$0xff] %v931_v31  ;;  %v932_v34 = vmax.f32 %v908_v32, 0.0 }
 0x43b   :  { %950 = vst [vmem:[#allocation16 + $0x78] sm:$0xff] %v934_v33 }
 0x43c   :  { %948 = vst [vmem:[#allocation16 + $0x68] sm:$0xff] %v932_v34 }
 0x43d   :  { %1447 = shalt.err (!%p1444_p12)
}
 0x43e   :  { %s1448_s11 = scalar_lea.hbm %s1681_s8, 2048 }
 0x43f   :  { %p1449_p13 = scmp.ne.s32.totalorder %s1681_s8, %s1448_s11  ;;  %p1452_p0 = scmp.lt.u32.totalorder %s1448_s11, %s1681_s8 }
 0x441   :  { %p1454_p1 = pnand %p1452_p0, %p1449_p13 }
 0x443   :  { %1457 = shalt.err (!%p1454_p1)
}
 0x444   :  { %s1481_s20 = smov 128   ;;  %s1482_s21 = smov 8  }
 0x445   :  { %962 = dma.vmem_to_hbm [thread:$0]  %s957_s18, 2048, %s1681_s8, [#allocation4], %s1481_s20, %s1481_s20, %s1482_s21  }
 0x446   :  { %1468 = dma.done.wait [#allocation4], 2048  }
 0x447   :  { %1469 = vsyncadd [#allocation4], 4294965248 }
 0x448   :  { %966 = vsyncpa [#allocation3], 1 }
 0x449   :  { %967 = vsyncpa [#allocation6], 1 }
 0x44a   :  { %968 = vsyncpa [#allocation9], 1 }
 0x44b   :  { %969 = vsyncpa [#allocation12], 1 }
 0x44c   :  { %970 = vsyncpa [#allocation15], 1 }
 0x44d   :  { %971 = vsyncpa [#allocation4], 1 }

</bundles_post_ra>
